<compile_context>
chip_gen: v7x
topology: tpu7x:2x2x1
jax: 0.10.0
libtpu: 0.0.40
codegen_flags: <defaults>
</compile_context>

<pallas_src>
import functools

import jax
import jax.numpy as jnp
from jax.experimental import pallas as pl
from jax.experimental.pallas import tpu as pltpu


def _round_up(x, m):
    return ((x + m - 1) // m) * m


def _choose_tile_n(n_rows, class_count, logits_dtype, vmem_budget_bytes=24 << 20):
    """Largest row tile whose double-buffered blocks fit the VMEM budget."""
    dtype_bytes = jnp.dtype(logits_dtype).itemsize
    c_lanes = _round_up(class_count, 128)       # logits block lane-pads to 128
    per_row = 2 * c_lanes * dtype_bytes         # logits, double buffered
    per_row += 2 * 128 * 4                      # labels (tile_n,1) lane-pads to 128 i32
    tile = vmem_budget_bytes // per_row
    tile = min(tile, 2048, _round_up(n_rows, 8))
    tile = max(8, (tile // 8) * 8)              # sublane multiple
    return int(tile)


def _ce_partial_kernel(logits_ref, labels_ref, out_ref, *, n_rows, tile_n):
    """Writes this tile's masked cross-entropy partial sum (broadcast to lanes)."""
    i = pl.program_id(0)

    logits = logits_ref[...].astype(jnp.float32)            # (tile_n, C)
    labels = labels_ref[...]                                  # (tile_n, 1) int32

    # validity: label != -1 AND row actually exists (ragged last tile)
    row = jax.lax.broadcasted_iota(jnp.int32, (tile_n, 1), 0) + i * tile_n
    valid = (labels != -1) & (row < n_rows)                   # (tile_n, 1) bool

    # zero out ignored / out-of-bounds rows BEFORE the transcendental math so
    # garbage data in the partial last block can never produce NaN/Inf.
    logits = jnp.where(valid, logits, 0.0)

    # numerically-stable log-sum-exp per row
    m = jnp.max(logits, axis=-1, keepdims=True)               # (tile_n, 1)
    lse = m + jnp.log(jnp.sum(jnp.exp(logits - m), axis=-1, keepdims=True))

    # gather logits[row, label[row]] via one-hot (no dynamic gather on TPU)
    col = jax.lax.broadcasted_iota(jnp.int32, logits.shape, 1)
    onehot = (col == labels).astype(jnp.float32)              # (tile_n, C)
    picked = jnp.sum(logits * onehot, axis=-1, keepdims=True)

    tile_loss = jnp.sum(jnp.where(valid, lse - picked, 0.0))  # scalar

    # independent per-tile output block -> grid axis can be "parallel"
    out_ref[...] = tile_loss + jnp.zeros_like(out_ref)


@jax.jit
def cross_entropy_loss(predictions, label_batch, length_batch):
    """Mirrors control_tasks CrossEntropyLoss.forward for 2-D label batches.

    Args:
      predictions:  (batch, seq, class) float logits (f32 or bf16)
      label_batch:  (batch, seq) int labels, -1 == ignore
      length_batch: (batch,) int sentence lengths

    Returns:
      (cross_entropy_loss, total_sents)
    """
    batchlen, seqlen, class_count = predictions.shape
    n = batchlen * seqlen

    logits = predictions.reshape(n, class_count)
    labels = label_batch.reshape(n, 1).astype(jnp.int32)

    tile_n = _choose_tile_n(n, class_count, logits.dtype)
    num_tiles = pl.cdiv(n, tile_n)
    dtype_bytes = jnp.dtype(logits.dtype).itemsize

    partials = pl.pallas_call(
        functools.partial(_ce_partial_kernel, n_rows=n, tile_n=tile_n),
        out_shape=jax.ShapeDtypeStruct((num_tiles, 1, 128), jnp.float32),
        grid_spec=pltpu.PrefetchScalarGridSpec(
            num_scalar_prefetch=0,
            grid=(num_tiles,),
            in_specs=[
                pl.BlockSpec((tile_n, class_count), lambda i: (i, 0)),
                pl.BlockSpec((tile_n, 1), lambda i: (i, 0)),
            ],
            out_specs=pl.BlockSpec((1, 1, 128), lambda i: (i, 0, 0)),
        ),
        compiler_params=pltpu.CompilerParams(
            dimension_semantics=("parallel",),
            vmem_limit_bytes=32 * 1024 * 1024,
        ),
        cost_estimate=pl.CostEstimate(
            flops=5 * n * class_count,
            transcendentals=n * class_count,
            bytes_accessed=n * class_count * dtype_bytes + n * 4 + num_tiles * 512,
        ),
    )(logits, labels)

    ce_sum = jnp.sum(partials[:, 0, 0])

    # number of sentences in the batch (trivial glue, kept in plain JAX)
    total_sents = jnp.sum(length_batch != 0).astype(jnp.float32)

    loss = ce_sum / total_sents
    return loss, total_sents


if __name__ == "__main__":
    key = jax.random.PRNGKey(0)
    batch, seq, classes = 2, 8, 32

    k1, k2, k3 = jax.random.split(key, 3)
    predictions = jax.random.normal(k1, (batch, seq, classes), dtype=jnp.float32)
    labels = jax.random.randint(k2, (batch, seq), 0, classes, dtype=jnp.int32)
    # mark some positions as ignored (-1), like padding tokens
    ignore_mask = jax.random.bernoulli(k3, 0.25, (batch, seq))
    labels = jnp.where(ignore_mask, -1, labels)
    lengths = jnp.array([seq, seq - 3], dtype=jnp.int32)

    loss, total_sents = cross_entropy_loss(predictions, labels, lengths)
    jax.block_until_ready((loss, total_sents))

    # pure-JAX reference for sanity
    logp = jax.nn.log_softmax(predictions.reshape(-1, classes), axis=-1)
    lab = labels.reshape(-1)
    valid = lab != -1
    ref_sum = -jnp.sum(
        jnp.where(valid, jnp.take_along_axis(
            logp, jnp.clip(lab, 0)[:, None], axis=-1)[:, 0], 0.0))
    ref_loss = ref_sum / jnp.sum(lengths != 0).astype(jnp.float32)
    assert jnp.allclose(loss, ref_loss, rtol=1e-5, atol=1e-5), (loss, ref_loss)

    print("KERNEL_OK")
</pallas_src>

<mosaic_0001>
module attributes {stable_mosaic.version = 11 : i64} {
  func.func @_ce_partial_kernel(%arg0: i32, %arg1: memref<16x32xf32, #tpu.memory_space<vmem>>, %arg2: memref<16x1xi32, #tpu.memory_space<vmem>>, %arg3: memref<1x1x128xf32, #tpu.memory_space<vmem>>) attributes {dimension_semantics = [#tpu.dimension_semantics<parallel>], iteration_bounds = array<i64: 1>, scalar_prefetch = 0 : i64, scratch_operands = 0 : i64, tpu.core_type = #tpu.core_type<tc>, window_params = [{transform_indices = @transform_0, window_bounds = array<i64: 16, 32>}, {transform_indices = @transform_1, window_bounds = array<i64: 16, 1>}, {transform_indices = @transform_2, window_bounds = array<i64: 1, 1, 128>}]} {
    %c0 = arith.constant 0 : index
    %c0_0 = arith.constant 0 : index
    %0 = vector.load %arg1[%c0, %c0_0] : memref<16x32xf32, #tpu.memory_space<vmem>>, vector<16x32xf32>
    %c0_1 = arith.constant 0 : index
    %c0_2 = arith.constant 0 : index
    %1 = vector.load %arg2[%c0_1, %c0_2] : memref<16x1xi32, #tpu.memory_space<vmem>>, vector<16x1xi32>
    %2 = tpu.iota {dimensions = array<i32: 0>} : vector<16x1xi32>
    %c16_i32 = arith.constant 16 : i32
    %3 = arith.muli %arg0, %c16_i32 : i32
    %4 = vector.broadcast %3 : i32 to vector<16x1xi32>
    %5 = arith.addi %2, %4 : vector<16x1xi32>
    %c-1_i32 = arith.constant -1 : i32
    %6 = vector.broadcast %c-1_i32 : i32 to vector<16x1xi32>
    %7 = arith.cmpi ne, %1, %6 : vector<16x1xi32>
    %c16_i32_3 = arith.constant 16 : i32
    %8 = vector.broadcast %c16_i32_3 : i32 to vector<16x1xi32>
    %9 = arith.cmpi slt, %5, %8 : vector<16x1xi32>
    %10 = arith.andi %7, %9 : vector<16x1xi1>
    %cst = arith.constant 0.000000e+00 : f32
    %11 = vector.shape_cast %10 : vector<16x1xi1> to vector<16x1xi1>
    %12 = vector.broadcast %11 : vector<16x1xi1> to vector<16x32xi1>
    %13 = vector.broadcast %cst : f32 to vector<16x32xf32>
    %14 = arith.select %12, %0, %13 : vector<16x32xi1>, vector<16x32xf32>
    %cst_4 = arith.constant dense<0xFF800000> : vector<16xf32>
    %15 = vector.multi_reduction <maximumf>, %14, %cst_4 [1] : vector<16x32xf32> to vector<16xf32>
    %16 = vector.shape_cast %15 : vector<16xf32> to vector<16x1xf32>
    %17 = vector.broadcast %16 : vector<16x1xf32> to vector<16x32xf32>
    %18 = arith.subf %14, %17 : vector<16x32xf32>
    %19 = math.exp %18 : vector<16x32xf32>
    %cst_5 = arith.constant dense<0.000000e+00> : vector<16xf32>
    %20 = vector.multi_reduction <add>, %19, %cst_5 [1] : vector<16x32xf32> to vector<16xf32>
    %21 = vector.shape_cast %20 : vector<16xf32> to vector<16x1xf32>
    %22 = math.log %21 : vector<16x1xf32>
    %23 = arith.addf %16, %22 : vector<16x1xf32>
    %24 = tpu.iota {dimensions = array<i32: 1>} : vector<16x32xi32>
    %25 = vector.broadcast %1 : vector<16x1xi32> to vector<16x32xi32>
    %26 = arith.cmpi eq, %24, %25 : vector<16x32xi32>
    %27 = arith.extui %26 : vector<16x32xi1> to vector<16x32xi32>
    %28 = arith.sitofp %27 : vector<16x32xi32> to vector<16x32xf32>
    %29 = arith.mulf %14, %28 : vector<16x32xf32>
    %cst_6 = arith.constant dense<0.000000e+00> : vector<16xf32>
    %30 = vector.multi_reduction <add>, %29, %cst_6 [1] : vector<16x32xf32> to vector<16xf32>
    %31 = vector.shape_cast %30 : vector<16xf32> to vector<16x1xf32>
    %32 = arith.subf %23, %31 : vector<16x1xf32>
    %cst_7 = arith.constant 0.000000e+00 : f32
    %33 = vector.broadcast %cst_7 : f32 to vector<16x1xf32>
    %34 = arith.select %10, %32, %33 : vector<16x1xi1>, vector<16x1xf32>
    %35 = vector.shape_cast %34 : vector<16x1xf32> to vector<1x16x1xf32>
    %cst_8 = arith.constant dense<0.000000e+00> : vector<1xf32>
    %36 = vector.multi_reduction <add>, %35, %cst_8 [1, 2] : vector<1x16x1xf32> to vector<1xf32>
    %37 = vector.shape_cast %36 : vector<1xf32> to vector<1x1x1xf32>
    %38 = vector.extract %37[0, 0, 0] : f32 from vector<1x1x1xf32>
    %cst_9 = arith.constant 0.000000e+00 : f32
    %39 = vector.broadcast %cst_9 : f32 to vector<1x1x128xf32>
    %40 = vector.broadcast %38 : f32 to vector<1x1x128xf32>
    %41 = arith.addf %40, %39 : vector<1x1x128xf32>
    %c0_10 = arith.constant 0 : index
    %c0_11 = arith.constant 0 : index
    %c0_12 = arith.constant 0 : index
    %42 = vector.load %arg3[%c0_10, %c0_11, %c0_12] : memref<1x1x128xf32, #tpu.memory_space<vmem>>, vector<1x1x128xf32>
    tpu.vector_store %arg3[%c0_10, %c0_11, %c0_12], %41 {strides = array<i32>} : memref<1x1x128xf32, #tpu.memory_space<vmem>>, vector<1x1x128xf32>,
    return
  }
  func.func @transform_0(%arg0: i32) -> (i32, i32) {
    %c0_i32 = arith.constant 0 : i32
    %c0_i32_0 = arith.constant 0 : i32
    return %arg0, %c0_i32 : i32, i32
  }
  func.func @transform_1(%arg0: i32) -> (i32, i32) {
    %c0_i32 = arith.constant 0 : i32
    %c0_i32_0 = arith.constant 0 : i32
    return %arg0, %c0_i32 : i32, i32
  }
  func.func @transform_2(%arg0: i32) -> (i32, i32, i32) {
    %c0_i32 = arith.constant 0 : i32
    %c0_i32_0 = arith.constant 0 : i32
    %c0_i32_1 = arith.constant 0 : i32
    return %arg0, %c0_i32, %c0_i32_0 : i32, i32, i32
  }
}

</mosaic_0001>

<bundles_post_ra>
// kernel: cross_entropy_loss.1
= control target key start
LH: loop header
LB: loop body
LE: loop exit
PB: predicated region body
PF: predicated region fallthrough
CT: control target
= control target key end

     0   :  { %v127_v0 = vmov 0   ;;  %vm40_vm2 = vcmask 261120   ;;  %v65_v15 = vlaneseq  ;;  %v128_v23 = vmov 0.0   ;;  %s181_s1 = inlined_call_operand.vmem [shape: s32[16,1], index: 1, kind: input, shape index: {}]   ;;  %s182_s0 = inlined_call_operand.vmem [shape: f32[16,32], index: 0, kind: input, shape index: {}]   ;;  %s183_s2 = inlined_call_operand.vmem [shape: f32[1,1,128], index: 2, kind: output, shape index: {}]  }
   0x1   :  { %117 = vset.pattern.permute.xlu0 %v127_v0  ;;  %v147_v1 = vld [vmem:[%s181_s1] sm:$0xff]  ;;  %v152_v2 = vld [vmem:[%s181_s1 + $0x8] sm:$0xff]  ;;  %118 = vset.pattern.permute.xlu1 %v127_v0  ;;  %vm91_vm7 = vcmask 7168  }
   0x2   :  { %vm22_vm0 = vcmp.ne.s32.totalorder %v147_v1, 4294967295  ;;  %vm23_vm1 = vcmp.ne.s32.totalorder %v152_v2, 4294967295  ;;  %v11_v5 = vld [vmem:[%s182_s0] sm:$0xff]  ;;  %v12_v8 = vld [vmem:[%s182_s0 + $0x8] sm:$0xff]  ;;  %v66_v19 = vand.u32 127, %v65_v15 }
   0x3   :  { %v28_v3 = vsel %vm22_vm0, 1, %v127_v0  ;;  %v29_v4 = vsel %vm23_vm1, 1, %v127_v0 }
   0x4   :  { %31 = vperm.xlu0 %117, %v28_v3  }
   0x8   :  { %34 = vperm.xlu0 %117, %v29_v4  }
   0xc   :  { %68 = vperm.xlu0 %117, %v147_v1  }
  0x83   :  { %v32_v6 = vpop.permute.xlu0 %31 }
  0x84   :  { %vm36_vm3 = vcmp.eq.s32.totalorder %v32_v6, 1 }
  0x85   :  { %v38_v7 = vsel %vm36_vm3, %v11_v5, 0.0 }
  0x86   :  { %v41_v9 = vsel %vm40_vm2, %v38_v7, -inf }
  0x87   :  { %v35_v10 = vpop.permute.xlu0 %34  ;;  %42 = vmax.xlane.f32.xlu1 %v41_v9 }
  0x88   :  { %vm37_vm4 = vcmp.eq.s32.totalorder %v35_v10, 1 }
  0x89   :  { %v39_v11 = vsel %vm37_vm4, %v12_v8, 0.0 }
  0x8a   :  { %v44_v12 = vsel %vm40_vm2, %v39_v11, -inf }
  0x8b   :  { %45 = vmax.xlane.f32.xlu1 %v44_v12  ;;  %v69_v20 = vpop.permute.xlu0 %68 }
  0x8c   :  { %vm73_vm5 = vcmp.eq.s32.totalorder %v66_v19, %v69_v20 }
  0x8d   :  { %v111_v24 = vsel %vm73_vm5, 1.0, %v128_v23 }
  0x8e   :  { %v79_v27 = vmul.f32 %v111_v24, %v38_v7 }
  0x90   :  { %v81_v30 = vsel %vm40_vm2, %v79_v27, 0.0 }
  0x9c   :  { %71 = vperm.xlu1 %118, %v152_v2  }
 0x114   :  { %v43_v13 = vpop.xlane.xlu1 %42 }
 0x115   :  { %v47_v14 = vsub.f32 %v38_v7, %v43_v13 }
 0x117   :  { %v49_v16 = vmul.f32 1.442695, %v47_v14 }
 0x118   :  { %v46_v17 = vpop.xlane.xlu1 %45 }
 0x119   :  { %119 = vpow2.f32 %v49_v16  ;;  %v48_v18 = vsub.f32 %v39_v11, %v46_v17 }
 0x11b   :  { %v51_v21 = vmul.f32 1.442695, %v48_v18 }
 0x11c   :  { %v72_v22 = vpop.permute.xlu1 %71 }
 0x11d   :  { %121 = vpow2.f32 %v51_v21  ;;  %vm74_vm6 = vcmp.eq.s32.totalorder %v66_v19, %v72_v22 }
 0x11e   :  { %v112_v28 = vsel %vm74_vm6, 1.0, %v128_v23 }
 0x11f   :  { %v80_v32 = vmul.f32 %v112_v28, %v39_v11 }
 0x121   :  { %v84_v33 = vsel %vm40_vm2, %v80_v32, 0.0 }
 0x123   :  { %v120_v25 = vpop.eup %119 }
 0x124   :  { %v53_v26 = vsel %vm40_vm2, %v120_v25, 0.0 }
 0x125   :  { %54 = vadd.xlane.f32.xlu0 %v53_v26 }
 0x127   :  { %v122_v29 = vpop.eup %121 }
 0x128   :  { %v56_v31 = vsel %vm40_vm2, %v122_v29, 0.0 }
 0x129   :  { %82 = vadd.xlane.f32.xlu0 %v81_v30  ;;  %57 = vadd.xlane.f32.xlu1 %v56_v31 }
 0x12d   :  { %85 = vadd.xlane.f32.xlu0 %v84_v33 }
 0x1b2   :  { %v55_v34 = vpop.xlane.xlu0 %54 }
 0x1b3   :  { %123 = vlog2.f32 %v55_v34 }
 0x1b6   :  { %v58_v35 = vpop.xlane.xlu1 %57  ;;  %v83_v38 = vpop.xlane.xlu0 %82 }
 0x1b7   :  { %125 = vlog2.f32 %v58_v35 }
 0x1ba   :  { %v86_v44 = vpop.xlane.xlu0 %85 }
 0x1bd   :  { %v124_v36 = vpop.eup %123 }
 0x1be   :  { %v60_v37 = vmul.f32 0.6931472, %v124_v36 }
 0x1c0   :  { %v63_v39 = vadd.f32 %v60_v37, %v43_v13 }
 0x1c1   :  { %v126_v40 = vpop.eup %125 }
 0x1c2   :  { %v87_v41 = vsub.f32 %v63_v39, %v83_v38  ;;  %v62_v42 = vmul.f32 0.6931472, %v126_v40 }
 0x1c4   :  { %v64_v43 = vadd.f32 %v62_v42, %v46_v17  ;;  %v89_v45 = vsel %vm22_vm0, %v87_v41, 0.0 }
 0x1c5   :  { %v92_v48 = vsel %vm91_vm7, %v89_v45, 0.0 }
 0x1c6   :  { %v88_v46 = vsub.f32 %v64_v43, %v86_v44 }
 0x1c8   :  { %v90_v47 = vsel %vm23_vm1, %v88_v46, 0.0 }
 0x1c9   :  { %v93_v49 = vsel %vm91_vm7, %v90_v47, 0.0 }
 0x1ca   :  { %v94_v50 = vadd.f32 %v93_v49, %v92_v48 }
 0x1cc   :  { %95 = vadd.xlane.f32.xlu0 %v94_v50 }
 0x259   :  { %v96_v51 = vpop.xlane.xlu0 %95 }
 0x25a   :  { %v97_v52 = vrot.slane %v96_v51, 4 }
 0x25c   :  { %v98_v53 = vadd.f32 %v97_v52, %v96_v51 }
 0x25e   :  { %v99_v54 = vrot.slane %v98_v53, 2 }
 0x260   :  { %v100_v55 = vadd.f32 %v99_v54, %v98_v53 }
 0x262   :  { %v101_v56 = vrot.slane %v100_v55, 1 }
 0x264   :  { %v102_v57 = vadd.f32 %v101_v56, %v100_v55 }
 0x266   :  { %113 = vpush %v102_v57 }
 0x297   :  { %s114_s0 = spop %113 }
 0x298   :  { %v104_v58 = vstv %s114_s0 }
 0x299   :  { %106 = vst [vmem:[%s183_s2] sm:$0x1] %v104_v58 }

</bundles_post_ra>
